<compile_context>
chip_gen: v6e
topology: v6e:2x2x1
jax: 0.10.0
libtpu: 0.0.40
codegen_flags: <defaults>
</compile_context>

<pallas_src>
import jax
import jax.numpy as jnp
from jax import lax
from jax.experimental import pallas as pl
from jax.experimental.pallas import tpu as pltpu


def _round_up(a: int, b: int) -> int:
    return (a + b - 1) // b * b


def _intermediate_kernel(x_ref, w_ref, b_ref, o_ref, acc_ref):
    # x_ref:   (tm, tk)  activation tile
    # w_ref:   (tn, tk)  weight tile, PyTorch (out, in) layout (no host transpose)
    # b_ref:   (1, tn)   bias tile
    # o_ref:   (tm, tn)  output tile
    # acc_ref: (tm, tn)  f32 accumulator scratch (persists across the K grid axis)
    k = pl.program_id(2)

    @pl.when(k == 0)
    def _init():
        acc_ref[...] = jnp.zeros_like(acc_ref)

    # x_tile @ w_tile.T on the MXU, accumulating in f32.
    acc_ref[...] += lax.dot_general(
        x_ref[...], w_ref[...],
        dimension_numbers=(((1,), (1,)), ((), ())),
        preferred_element_type=jnp.float32,
    )

    @pl.when(k == pl.num_programs(2) - 1)
    def _finalize():
        acc = acc_ref[...] + b_ref[...].astype(jnp.float32)
        o_ref[...] = jnp.maximum(acc, 0.0).astype(o_ref.dtype)


def intermediate_forward(x, weight, bias, *,
                         tile_m=256, tile_n=256, tile_k=512,
                         compute_dtype=None):
    """relu(x @ weight.T + bias).

    x:      (..., hidden)
    weight: (intermediate, hidden)   -- PyTorch nn.Linear layout, used as-is
    bias:   (intermediate,)
    compute_dtype: e.g. jnp.bfloat16 to cast MXU inputs (f32 accumulation kept).
    """
    orig_shape = x.shape
    hidden = orig_shape[-1]
    inter = weight.shape[0]
    out_dtype = x.dtype

    x2d = x.reshape(-1, hidden)
    M = x2d.shape[0]

    if compute_dtype is not None:
        x2d = x2d.astype(compute_dtype)
        weight = weight.astype(compute_dtype)

    # ---- tile selection, aligned to (8,128) vreg tiling / MXU granularity ----
    tm = max(8, min(tile_m, _round_up(M, 8)) // 8 * 8)
    N = _round_up(inter, 128)                  # lane-dense output stores
    tn = max(128, min(tile_n, N) // 128 * 128)
    if hidden <= tile_k:
        tk = hidden                            # single K step (full contraction)
    else:
        tk = max(128, tile_k // 128 * 128)

    Mp = _round_up(M, tm)
    Kp = _round_up(hidden, tk)
    Np = _round_up(N, tn)

    # ---- zero-pad to tile multiples (no-op for typical transformer sizes) ----
    if (Mp, Kp) != (M, hidden):
        x2d = jnp.pad(x2d, ((0, Mp - M), (0, Kp - hidden)))
    w = weight
    if (Np, Kp) != (inter, hidden):
        w = jnp.pad(w, ((0, Np - inter), (0, Kp - hidden)))
    b = bias if Np == inter else jnp.pad(bias, (0, Np - inter))
    b2d = b.reshape(1, Np)

    grid = (Mp // tm, Np // tn, Kp // tk)

    # ---- explicit VMEM budget: double-buffered I/O tiles + f32 accumulator ----
    in_b = jnp.dtype(x2d.dtype).itemsize
    w_b = jnp.dtype(w.dtype).itemsize
    out_b = jnp.dtype(out_dtype).itemsize
    need = (2 * (tm * tk * in_b + tn * tk * w_b + tn * w_b + tm * tn * out_b)
            + tm * tn * 4)
    vmem_limit = int(min(max(2 * need, 16 * 1024 * 1024), 64 * 1024 * 1024))

    out = pl.pallas_call(
        _intermediate_kernel,
        out_shape=jax.ShapeDtypeStruct((Mp, Np), out_dtype),
        grid_spec=pltpu.PrefetchScalarGridSpec(
            num_scalar_prefetch=0,
            grid=grid,
            in_specs=[
                pl.BlockSpec((tm, tk), lambda i, j, k: (i, k)),   # activations
                pl.BlockSpec((tn, tk), lambda i, j, k: (j, k)),   # weight (streamed)
                pl.BlockSpec((1, tn), lambda i, j, k: (0, j)),    # bias
            ],
            out_specs=pl.BlockSpec((tm, tn), lambda i, j, k: (i, j)),
            scratch_shapes=[pltpu.VMEM((tm, tn), jnp.float32)],
        ),
        compiler_params=pltpu.CompilerParams(
            dimension_semantics=("parallel", "parallel", "arbitrary"),
            vmem_limit_bytes=vmem_limit,
        ),
    )(x2d, w, b2d)

    out = out[:M, :inter]
    return out.reshape(*orig_shape[:-1], inter)


if __name__ == "__main__":
    # Shapes consistent with the module: (batch, seq, hidden) -> (batch, seq, intermediate)
    batch, seq, hidden, intermediate = 2, 8, 32, 64
    keys = jax.random.split(jax.random.PRNGKey(0), 6)

    x = jax.random.normal(keys[0], (batch, seq, hidden), dtype=jnp.float32)
    bound = 1.0 / (hidden ** 0.5)
    weight = jax.random.uniform(keys[1], (intermediate, hidden), jnp.float32,
                                -bound, bound)
    bias = jax.random.uniform(keys[2], (intermediate,), jnp.float32, -bound, bound)

    out = intermediate_forward(x, weight, bias)
    out = jax.block_until_ready(out)
    ref = jnp.maximum(x @ weight.T + bias, 0.0)
    assert out.shape == (batch, seq, intermediate)
    assert jnp.allclose(out, ref, atol=1e-5, rtol=1e-5)

    # Exercise the multi-tile path (M, N and K grid axes all > 1) at small scale.
    h2, i2 = 256, 384
    x2 = jax.random.normal(keys[3], (batch, seq, h2), dtype=jnp.float32)
    b2 = 1.0 / (h2 ** 0.5)
    w2 = jax.random.uniform(keys[4], (i2, h2), jnp.float32, -b2, b2)
    bb2 = jax.random.uniform(keys[5], (i2,), jnp.float32, -b2, b2)

    out2 = intermediate_forward(x2, w2, bb2, tile_m=8, tile_n=128, tile_k=128)
    out2 = jax.block_until_ready(out2)
    ref2 = jnp.maximum(x2 @ w2.T + bb2, 0.0)
    assert out2.shape == (batch, seq, i2)
    assert jnp.allclose(out2, ref2, atol=1e-4, rtol=1e-4)

    # TODO(synk): torch.cuda.empty_cache() has no TPU/Pallas equivalent (allocator no-op).
    print("KERNEL_OK")
</pallas_src>

<mosaic_0001>
module attributes {stable_mosaic.version = 11 : i64} {
  func.func @_intermediate_kernel(%arg0: i32, %arg1: i32, %arg2: i32, %arg3: memref<16x32xf32, #tpu.memory_space<vmem>>, %arg4: memref<128x32xf32, #tpu.memory_space<vmem>>, %arg5: memref<1x128xf32, #tpu.memory_space<vmem>>, %arg6: memref<16x128xf32, #tpu.memory_space<vmem>>, %arg7: memref<16x128xf32, #tpu.memory_space<vmem>>) attributes {dimension_semantics = [#tpu.dimension_semantics<parallel>, #tpu.dimension_semantics<parallel>, #tpu.dimension_semantics<arbitrary>], iteration_bounds = array<i64: 1, 1, 1>, scalar_prefetch = 0 : i64, scratch_operands = 1 : i64, tpu.core_type = #tpu.core_type<tc>, window_params = [{transform_indices = @transform_0, window_bounds = array<i64: 16, 32>}, {transform_indices = @transform_1, window_bounds = array<i64: 128, 32>}, {transform_indices = @transform_2, window_bounds = array<i64: 1, 128>}, {transform_indices = @transform_3, window_bounds = array<i64: 16, 128>}]} {
    %c0_i32 = arith.constant 0 : i32
    %0 = arith.cmpi eq, %arg2, %c0_i32 : i32
    %1 = arith.extui %0 : i1 to i32
    %c0_i32_0 = arith.constant 0 : i32
    %2 = arith.cmpi ne, %1, %c0_i32_0 : i32
    scf.if %2 {
      %cst_10 = arith.constant 0.000000e+00 : f32
      %12 = vector.broadcast %cst_10 : f32 to vector<16x128xf32>
      %c0_11 = arith.constant 0 : index
      %c0_12 = arith.constant 0 : index
      %13 = vector.load %arg7[%c0_11, %c0_12] : memref<16x128xf32, #tpu.memory_space<vmem>>, vector<16x128xf32>
      tpu.vector_store %arg7[%c0_11, %c0_12], %12 {strides = array<i32>} : memref<16x128xf32, #tpu.memory_space<vmem>>, vector<16x128xf32>,
    } else {
    }
    %c0 = arith.constant 0 : index
    %c0_1 = arith.constant 0 : index
    %3 = vector.load %arg7[%c0, %c0_1] : memref<16x128xf32, #tpu.memory_space<vmem>>, vector<16x128xf32>
    %c0_2 = arith.constant 0 : index
    %c0_3 = arith.constant 0 : index
    %4 = vector.load %arg3[%c0_2, %c0_3] : memref<16x32xf32, #tpu.memory_space<vmem>>, vector<16x32xf32>
    %c0_4 = arith.constant 0 : index
    %c0_5 = arith.constant 0 : index
    %5 = vector.load %arg4[%c0_4, %c0_5] : memref<128x32xf32, #tpu.memory_space<vmem>>, vector<128x32xf32>
    %cst = arith.constant dense<0.000000e+00> : vector<16x128xf32>
    %6 = tpu.matmul %4, %5, %cst {dimension_numbers = #tpu.dot_dimension_numbers<[1], [1], [0], [0], [0, 0, 1, 0], [], []>} : vector<16x32xf32>, vector<128x32xf32>, vector<16x128xf32> -> vector<16x128xf32>
    %7 = arith.addf %3, %6 : vector<16x128xf32>
    %c0_6 = arith.constant 0 : index
    %c0_7 = arith.constant 0 : index
    %8 = vector.load %arg7[%c0_6, %c0_7] : memref<16x128xf32, #tpu.memory_space<vmem>>, vector<16x128xf32>
    tpu.vector_store %arg7[%c0_6, %c0_7], %7 {strides = array<i32>} : memref<16x128xf32, #tpu.memory_space<vmem>>, vector<16x128xf32>,
    %c0_i32_8 = arith.constant 0 : i32
    %9 = arith.cmpi eq, %arg2, %c0_i32_8 : i32
    %10 = arith.extui %9 : i1 to i32
    %c0_i32_9 = arith.constant 0 : i32
    %11 = arith.cmpi ne, %10, %c0_i32_9 : i32
    scf.if %11 {
      %c0_10 = arith.constant 0 : index
      %c0_11 = arith.constant 0 : index
      %12 = vector.load %arg7[%c0_10, %c0_11] : memref<16x128xf32, #tpu.memory_space<vmem>>, vector<16x128xf32>
      %c0_12 = arith.constant 0 : index
      %c0_13 = arith.constant 0 : index
      %13 = vector.load %arg5[%c0_12, %c0_13] : memref<1x128xf32, #tpu.memory_space<vmem>>, vector<1x128xf32>
      %14 = vector.broadcast %13 : vector<1x128xf32> to vector<16x128xf32>
      %15 = arith.addf %12, %14 : vector<16x128xf32>
      %cst_14 = arith.constant 0.000000e+00 : f32
      %16 = vector.broadcast %cst_14 : f32 to vector<16x128xf32>
      %17 = arith.maximumf %15, %16 : vector<16x128xf32>
      %c0_15 = arith.constant 0 : index
      %c0_16 = arith.constant 0 : index
      %18 = vector.load %arg6[%c0_15, %c0_16] : memref<16x128xf32, #tpu.memory_space<vmem>>, vector<16x128xf32>
      tpu.vector_store %arg6[%c0_15, %c0_16], %17 {strides = array<i32>} : memref<16x128xf32, #tpu.memory_space<vmem>>, vector<16x128xf32>,
    } else {
    }
    return
  }
  func.func @transform_0(%arg0: i32, %arg1: i32, %arg2: i32) -> (i32, i32) {
    %c0_i32 = arith.constant 0 : i32
    return %arg0, %arg2 : i32, i32
  }
  func.func @transform_1(%arg0: i32, %arg1: i32, %arg2: i32) -> (i32, i32) {
    %c0_i32 = arith.constant 0 : i32
    return %arg1, %arg2 : i32, i32
  }
  func.func @transform_2(%arg0: i32, %arg1: i32, %arg2: i32) -> (i32, i32) {
    %c0_i32 = arith.constant 0 : i32
    %c0_i32_0 = arith.constant 0 : i32
    return %c0_i32, %arg1 : i32, i32
  }
  func.func @transform_3(%arg0: i32, %arg1: i32, %arg2: i32) -> (i32, i32) {
    %c0_i32 = arith.constant 0 : i32
    return %arg0, %arg1 : i32, i32
  }
}

</mosaic_0001>

<bundles_post_ra>
// kernel: tpu_custom_call.1
= control target key start
LH: loop header
LB: loop body
LE: loop exit
PB: predicated region body
PF: predicated region fallthrough
CT: control target
= control target key end

     0   :  { %vm41_vm0 = vcmask 261120   ;;  %s423_s0 = inlined_call_operand.vmem [shape: f32[16,32], index: 0, kind: input, shape index: {}]   ;;  %s424_s1 = inlined_call_operand.vmem [shape: f32[128,32], index: 1, kind: input, shape index: {}]   ;;  %s425_s2 = inlined_call_operand.vmem [shape: f32[1,128], index: 2, kind: input, shape index: {}]   ;;  %s426_s3 = inlined_call_operand.hbm [shape: f32[16,128], index: 3, kind: output, shape index: {}]  }
   0x1   :  { %v40_v0 = vld [vmem:[%s424_s1 + $0x78] sm:$0xff]  ;;  %v39_v1 = vld [vmem:[%s424_s1 + $0x70] sm:$0xff]  ;;  %v38_v2 = vld [vmem:[%s424_s1 + $0x68] sm:$0xff] }
   0x2   :  { %246 = vmatprep.subr.msk.mxu0 %vm41_vm0, %v40_v0  ;;  %v23_v3 = vld [vmem:[%s423_s0] sm:$0xff] }
   0x3   :  { %247 = vmatpush3.xpose.msk.msra.mxu0 %vm41_vm0, %v40_v0  ;;  %278 = vmatprep.mubr.msk.f32.mxu0 %vm41_vm0, %v23_v3 }
   0x4   :  { %248 = vmatprep.subr.msk.mxu0 %vm41_vm0, %v39_v1 }
   0x7   :  { %249 = vmatpush3.xpose.msk.msra.mxu0 %vm41_vm0, %v39_v1 }
   0x8   :  { %8 = vsyncpa [#allocation4], 0  ;;  %250 = vmatprep.subr.msk.mxu0 %vm41_vm0, %v38_v2  ;;  %v37_v4 = vld [vmem:[%s424_s1 + $0x60] sm:$0xff]  ;;  %v36_v5 = vld [vmem:[%s424_s1 + $0x58] sm:$0xff]  ;;  %s306_s23 = smov [#allocation3]  }
   0x9   :  { %v35_v6 = vld [vmem:[%s424_s1 + $0x50] sm:$0xff]  ;;  %v34_v7 = vld [vmem:[%s424_s1 + $0x48] sm:$0xff]  ;;  %v33_v8 = vld [vmem:[%s424_s1 + $0x40] sm:$0xff] }
   0xa   :  { %v32_v9 = vld [vmem:[%s424_s1 + $0x38] sm:$0xff]  ;;  %v31_v10 = vld [vmem:[%s424_s1 + $0x30] sm:$0xff]  ;;  %v30_v11 = vld [vmem:[%s424_s1 + $0x28] sm:$0xff] }
   0xb   :  { %251 = vmatpush3.xpose.msk.msra.mxu0 %vm41_vm0, %v38_v2  ;;  %v29_v12 = vld [vmem:[%s424_s1 + $0x20] sm:$0xff]  ;;  %v28_v13 = vld [vmem:[%s424_s1 + $0x18] sm:$0xff]  ;;  %v27_v14 = vld [vmem:[%s424_s1 + $0x10] sm:$0xff] }
   0xc   :  { %252 = vmatprep.subr.msk.mxu0 %vm41_vm0, %v37_v4  ;;  %v26_v15 = vld [vmem:[%s424_s1 + $0x8] sm:$0xff]  ;;  %v25_v16 = vld [vmem:[%s424_s1] sm:$0xff]  ;;  %s198_s1 = sshll.u32 %s306_s23, 4  ;;  %s199_s1 = int_to_ptr.vmem [resolvable:$true] %s198_s1 }
   0xd   :  { %v24_v17 = vld [vmem:[%s423_s0 + $0x8] sm:$0xff]  ;;  %v227_v18 = vld [vmem:[%s425_s2] ss:$0 sm:$0xff]  ;;  %s284_s24 = scalar_lea.vmem %s199_s1, 256  ;;  %p289_p1 = scmp.lt.s32.totalorder %s199_s1, %s199_s1 }
   0xe   :  { %p285_p0 = scmp.ne.s32.totalorder %s199_s1, %s284_s24  ;;  %p290_p2 = scmp.lt.s32.totalorder %s284_s24, %s284_s24 }
   0xf   :  { %253 = vmatpush3.xpose.msk.msra.mxu0 %vm41_vm0, %v37_v4 }
  0x10   :  { %254 = vmatprep.subr.msk.mxu0 %vm41_vm0, %v36_v5  ;;  %p291_p3 = por %p290_p2, %p289_p1 }
  0x12   :  { %p292_p4 = pnand %p291_p3, %p285_p0 }
  0x13   :  { %255 = vmatpush3.xpose.msk.msra.mxu0 %vm41_vm0, %v36_v5 }
  0x14   :  { %256 = vmatprep.subr.msk.mxu0 %vm41_vm0, %v35_v6 }
  0x17   :  { %257 = vmatpush3.xpose.msk.msra.mxu0 %vm41_vm0, %v35_v6 }
  0x18   :  { %258 = vmatprep.subr.msk.mxu0 %vm41_vm0, %v34_v7 }
  0x1b   :  { %259 = vmatpush3.xpose.msk.msra.mxu0 %vm41_vm0, %v34_v7 }
  0x1c   :  { %260 = vmatprep.subr.msk.mxu0 %vm41_vm0, %v33_v8 }
  0x1f   :  { %261 = vmatpush3.xpose.msk.msra.mxu0 %vm41_vm0, %v33_v8 }
  0x20   :  { %262 = vmatprep.subr.msk.mxu0 %vm41_vm0, %v32_v9 }
  0x23   :  { %263 = vmatpush3.xpose.msk.msra.mxu0 %vm41_vm0, %v32_v9 }
  0x24   :  { %264 = vmatprep.subr.msk.mxu0 %vm41_vm0, %v31_v10 }
  0x27   :  { %265 = vmatpush3.xpose.msk.msra.mxu0 %vm41_vm0, %v31_v10 }
  0x28   :  { %266 = vmatprep.subr.msk.mxu0 %vm41_vm0, %v30_v11 }
  0x2b   :  { %267 = vmatpush3.xpose.msk.msra.mxu0 %vm41_vm0, %v30_v11 }
  0x2c   :  { %268 = vmatprep.subr.msk.mxu0 %vm41_vm0, %v29_v12 }
  0x2f   :  { %269 = vmatpush3.xpose.msk.msra.mxu0 %vm41_vm0, %v29_v12 }
  0x30   :  { %270 = vmatprep.subr.msk.mxu0 %vm41_vm0, %v28_v13 }
  0x33   :  { %271 = vmatpush3.xpose.msk.msra.mxu0 %vm41_vm0, %v28_v13 }
  0x34   :  { %272 = vmatprep.subr.msk.mxu0 %vm41_vm0, %v27_v14 }
  0x37   :  { %273 = vmatpush3.xpose.msk.msra.mxu0 %vm41_vm0, %v27_v14 }
  0x38   :  { %274 = vmatprep.subr.msk.mxu0 %vm41_vm0, %v26_v15 }
  0x3b   :  { %275 = vmatpush3.xpose.msk.msra.mxu0 %vm41_vm0, %v26_v15 }
  0x3c   :  { %276 = vmatprep.subr.msk.mxu0 %vm41_vm0, %v25_v16 }
  0x3f   :  { %277 = vmatpush3.xpose.msk.msra.mxu0 %vm41_vm0, %v25_v16 }
  0x42   :  { %279 = vmatmul.mubr.msk.f32.vlgmr.msra.gmra.mxu0 %vm41_vm0, %v24_v17 }
 0x102   :  { %v280_v19 = vpop.f32.mrf.mxu0 }
 0x103   :  { %v188_v20 = vadd.f32 %v280_v19, %v227_v18 }
 0x104   :  { %v162_v21 = vpop.f32.mrf.mxu0 }
 0x105   :  { %v190_v22 = vmax.f32 %v188_v20, 0.0  ;;  %v187_v23 = vadd.f32 %v227_v18, %v162_v21 }
 0x107   :  { %192 = vst [vmem:[#allocation3 + $0x8] sm:$0xff] %v190_v22  ;;  %v189_v24 = vmax.f32 %v187_v23, 0.0 }
 0x109   :  { %191 = vst [vmem:[#allocation3] sm:$0xff] %v189_v24 }
 0x10a   :  { %295 = shalt.err (!%p292_p4)
}
 0x10b   :  { %s307_s0 = smov 128   ;;  %s308_s2 = smov 8  }
 0x10c   :  { %204 = dma.vmem_to_hbm [thread:$0]  %s199_s1, 256, %s426_s3, [#allocation4], %s307_s0, %s307_s0, %s308_s2  }
 0x10d   :  { %304 = dma.done.wait [#allocation4], 256  }
 0x10e   :  { %305 = vsyncadd [#allocation4], 4294967040 }
 0x10f   :  { %208 = vsyncpa [#allocation4], 1 }

</bundles_post_ra>
